<compile_context>
chip_gen: v6e
topology: v6e:2x2x1
jax: 0.10.0
libtpu: 0.0.40
codegen_flags: <defaults>
</compile_context>

<pallas_src>
import jax
import jax.numpy as jnp
from jax.experimental import pallas as pl
from jax.experimental.pallas import tpu as pltpu


def _round_up(x, m):
    return ((x + m - 1) // m) * m


def _pick_divisor_tile(B, batch_tile):
    """Largest multiple-of-8 divisor of B that is <= batch_tile, preferring >= 2 grid steps."""
    for cap in (min(batch_tile, B // 2), min(batch_tile, B)):
        cap = (cap // 8) * 8
        for tb in range(cap, 0, -8):
            if B % tb == 0:
                return tb
    return 0


def _concat_mlp_kernel(x0_ref, x1_ref, x2_ref, x3_ref, w_ref, b_ref, o_ref):
    """o = concat([x0..x3], -1) @ W + b.  Dropout(p=0.2) is identity in eval mode."""
    # Each xi_ref is a (TB, H_pad) CLS tile with H_pad % 128 == 0, so the lane-concat is
    # tile-aligned block placement feeding one fully-filled K = 4*H_pad MXU contraction.
    x_cat = jnp.concatenate(
        [x0_ref[...], x1_ref[...], x2_ref[...], x3_ref[...]], axis=-1)
    acc = jnp.dot(x_cat, w_ref[...], preferred_element_type=jnp.float32)
    o_ref[...] = (acc + b_ref[...]).astype(o_ref.dtype)


def concat_mlp_forward(hidden_states, fc_w, fc_b, *, batch_tile=256, compute_dtype=None):
    """ConcatMLP head.

    hidden_states: tuple of 4 arrays [B, S, H] (last four transformer layers)
    fc_w: [4H, C], fc_b: [C] or [1, C]  ->  logits [B, C] (float32)
    compute_dtype: optional dtype for the matmul operands (e.g. jnp.bfloat16 at production
    sizes); accumulation is always float32.
    """
    h0, h1, h2, h3 = hidden_states
    B, S, H = h0.shape
    K, C = fc_w.shape
    assert K == 4 * H, "fc_w must have 4*hidden_size rows"

    # Keep both matmul operands in the same dtype so the MXU sees a single native path.
    if compute_dtype is None:
        compute_dtype = h0.dtype
    itemsize = jnp.dtype(compute_dtype).itemsize

    # Lane-dense output: pad the class dim to a multiple of 128 (unmasked vst); the zero
    # columns never affect the first C outputs and are sliced away after the kernel.
    C_pad = _round_up(C, 128)

    # Direct-from-HBM CLS path only when the strided row chunk is lane-aligned and large
    # enough not to be descriptor/latency bound, and B has a clean multiple-of-8 tile divisor.
    tb_direct = _pick_divisor_tile(B, batch_tile)
    direct = (H % 128 == 0) and (H * itemsize >= 512) and (tb_direct >= 8)

    if direct:
        TB, B_eff, H_pad = tb_direct, B, H
        xs = tuple(h.astype(compute_dtype) for h in (h0, h1, h2, h3))
        # CLS-row-only slab with the size-1 seq dim squeezed out: kernel ref is (TB, H).
        hs_spec = pl.BlockSpec((TB, pl.Squeezed(), H), lambda i: (i, 0, 0))
    else:
        # Cheap XLA pre-slice of the CLS rows (only B*H elements per tensor), then pad H to a
        # lane multiple (tile-aligned concat) and B to a tile multiple (uniform, pipelined grid).
        H_pad = _round_up(H, 128)
        TB = min(batch_tile, _round_up(B, 8))
        if B > 8 and _round_up(B, TB) == TB:
            TB = _round_up(pl.cdiv(B, 2), 8)      # keep >= 2 grid steps (v7x dual-TC)
        B_eff = _round_up(B, TB)

        def _cls(h):
            x = h[:, 0, :].astype(compute_dtype)
            return jnp.pad(x, ((0, B_eff - B), (0, H_pad - H)))

        xs = tuple(_cls(h) for h in (h0, h1, h2, h3))
        hs_spec = pl.BlockSpec((TB, H_pad), lambda i: (i, 0))

    # Weight: per-block row padding (fc_w is four [H, C] blocks stacked) + lane-dense columns.
    if H_pad != H or C_pad != C:
        w = fc_w.reshape(4, H, C)
        w = jnp.pad(w, ((0, 0), (0, H_pad - H), (0, C_pad - C)))
        w = w.reshape(4 * H_pad, C_pad)
    else:
        w = fc_w
    w = w.astype(compute_dtype)

    # Bias stays f32 and is added to the f32 accumulator (accuracy independent of compute dtype).
    b = jnp.asarray(fc_b, dtype=jnp.float32).reshape(1, C)
    if C_pad != C:
        b = jnp.pad(b, ((0, 0), (0, C_pad - C)))

    grid = (B_eff // TB,)
    w_spec = pl.BlockSpec((4 * H_pad, C_pad), lambda i: (0, 0))   # resident across grid
    b_spec = pl.BlockSpec((1, C_pad), lambda i: (0, 0))           # resident across grid

    # VMEM budget: 4 double-buffered CLS slabs + double-buffered weight/bias/output buffers
    # + in-kernel x_cat copy + f32 accumulator.  Re-derived per call, capped well below v7x's
    # 64 MiB physical VMEM.
    est = (4 * 2 * TB * H_pad * itemsize
           + 2 * (4 * H_pad * C_pad) * itemsize + 2 * C_pad * 4
           + 2 * TB * C_pad * 4
           + TB * 4 * H_pad * itemsize
           + TB * C_pad * 4)
    vmem_limit = int(min(max(32 * 1024 * 1024, 2 * est), 56 * 1024 * 1024))

    out = pl.pallas_call(
        _concat_mlp_kernel,
        out_shape=jax.ShapeDtypeStruct((B_eff, C_pad), jnp.float32),
        grid=grid,
        in_specs=[hs_spec, hs_spec, hs_spec, hs_spec, w_spec, b_spec],
        out_specs=pl.BlockSpec((TB, C_pad), lambda i: (i, 0)),
        compiler_params=pltpu.CompilerParams(
            dimension_semantics=("parallel",),
            vmem_limit_bytes=vmem_limit,
        ),
    )(*xs, w, b)

    return out[:B, :C]


def reference_forward(hidden_states, fc_w, fc_b):
    cat = jnp.concatenate(hidden_states, axis=2)[:, 0, :]     # [B, 4H]
    return cat @ fc_w + jnp.asarray(fc_b).reshape(1, -1)       # [B, C]


if __name__ == "__main__":
    key = jax.random.PRNGKey(0)

    # Two small configs: the toy shapes implied by the module (exercises the pre-sliced /
    # padded path) and a lane-aligned config (exercises the direct CLS-row-DMA path with the
    # squeezed seq dim).  Both compare against a pure-JAX reference.
    for (B, S, H, C) in [(2, 8, 32, 8), (16, 8, 128, 8)]:
        key, k_h, k_w, k_b = jax.random.split(key, 4)

        # TODO(synk): tokenizer + pretrained transformer backbone have no Pallas equivalent;
        # the last-4 hidden states are simulated with deterministic randoms.
        hkeys = jax.random.split(k_h, 4)
        hidden_states = tuple(
            jax.random.normal(hkeys[i], (B, S, H), dtype=jnp.float32) for i in range(4))

        # fc = MLP(hidden_size*4, num_classes); MLP definition not shown -> single Linear layer.
        fc_w = jax.random.normal(k_w, (4 * H, C), dtype=jnp.float32) / jnp.sqrt(4.0 * H)
        fc_b = jax.random.normal(k_b, (1, C), dtype=jnp.float32) * 0.01

        out = jax.block_until_ready(concat_mlp_forward(hidden_states, fc_w, fc_b))
        ref = reference_forward(hidden_states, fc_w, fc_b)
        assert out.shape == (B, C)
        assert jnp.allclose(out, ref, atol=1e-4, rtol=1e-4), \
            f"mismatch vs reference for B={B}, S={S}, H={H}, C={C}"

    print("KERNEL_OK")
</pallas_src>

<mosaic_0001>
module attributes {stable_mosaic.version = 11 : i64} {
  func.func @_concat_mlp_kernel(%arg0: i32, %arg1: memref<8x128xf32, #tpu.memory_space<vmem>>, %arg2: memref<8x128xf32, #tpu.memory_space<vmem>>, %arg3: memref<8x128xf32, #tpu.memory_space<vmem>>, %arg4: memref<8x128xf32, #tpu.memory_space<vmem>>, %arg5: memref<512x128xf32, #tpu.memory_space<vmem>>, %arg6: memref<1x128xf32, #tpu.memory_space<vmem>>, %arg7: memref<8x128xf32, #tpu.memory_space<vmem>>) attributes {dimension_semantics = [#tpu.dimension_semantics<parallel>], iteration_bounds = array<i64: 1>, scalar_prefetch = 0 : i64, scratch_operands = 0 : i64, tpu.core_type = #tpu.core_type<tc>, window_params = [{transform_indices = @transform_0, window_bounds = array<i64: 8, 128>}, {transform_indices = @transform_1, window_bounds = array<i64: 8, 128>}, {transform_indices = @transform_2, window_bounds = array<i64: 8, 128>}, {transform_indices = @transform_3, window_bounds = array<i64: 8, 128>}, {pipeline_mode = #tpu.pipeline_mode<synchronous>, transform_indices = @transform_4, window_bounds = array<i64: 512, 128>}, {pipeline_mode = #tpu.pipeline_mode<synchronous>, transform_indices = @transform_5, window_bounds = array<i64: 1, 128>}, {transform_indices = @transform_6, window_bounds = array<i64: 8, 128>}]} {
    %c0 = arith.constant 0 : index
    %c0_0 = arith.constant 0 : index
    %0 = vector.load %arg1[%c0, %c0_0] : memref<8x128xf32, #tpu.memory_space<vmem>>, vector<8x128xf32>
    %c0_1 = arith.constant 0 : index
    %c0_2 = arith.constant 0 : index
    %1 = vector.load %arg2[%c0_1, %c0_2] : memref<8x128xf32, #tpu.memory_space<vmem>>, vector<8x128xf32>
    %c0_3 = arith.constant 0 : index
    %c0_4 = arith.constant 0 : index
    %2 = vector.load %arg3[%c0_3, %c0_4] : memref<8x128xf32, #tpu.memory_space<vmem>>, vector<8x128xf32>
    %c0_5 = arith.constant 0 : index
    %c0_6 = arith.constant 0 : index
    %3 = vector.load %arg4[%c0_5, %c0_6] : memref<8x128xf32, #tpu.memory_space<vmem>>, vector<8x128xf32>
    %4 = tpu.concatenate %0, %1, %2, %3 in 1 : vector<8x128xf32>, vector<8x128xf32>, vector<8x128xf32>, vector<8x128xf32> -> vector<8x512xf32>
    %c0_7 = arith.constant 0 : index
    %c0_8 = arith.constant 0 : index
    %5 = vector.load %arg5[%c0_7, %c0_8] : memref<512x128xf32, #tpu.memory_space<vmem>>, vector<512x128xf32>
    %cst = arith.constant dense<0.000000e+00> : vector<8x128xf32>
    %6 = tpu.matmul %4, %5, %cst {dimension_numbers = #tpu.dot_dimension_numbers<[1], [0], [0], [1], [0, 0, 1, 1], [], []>} : vector<8x512xf32>, vector<512x128xf32>, vector<8x128xf32> -> vector<8x128xf32>
    %c0_9 = arith.constant 0 : index
    %c0_10 = arith.constant 0 : index
    %7 = vector.load %arg6[%c0_9, %c0_10] : memref<1x128xf32, #tpu.memory_space<vmem>>, vector<1x128xf32>
    %8 = vector.broadcast %7 : vector<1x128xf32> to vector<8x128xf32>
    %9 = arith.addf %6, %8 : vector<8x128xf32>
    %c0_11 = arith.constant 0 : index
    %c0_12 = arith.constant 0 : index
    %10 = vector.load %arg7[%c0_11, %c0_12] : memref<8x128xf32, #tpu.memory_space<vmem>>, vector<8x128xf32>
    tpu.vector_store %arg7[%c0_11, %c0_12], %9 {strides = array<i32>} : memref<8x128xf32, #tpu.memory_space<vmem>>, vector<8x128xf32>,
    return
  }
  func.func @transform_0(%arg0: i32) -> (i32, i32) {
    %c0_i32 = arith.constant 0 : i32
    %c0_i32_0 = arith.constant 0 : i32
    return %arg0, %c0_i32 : i32, i32
  }
  func.func @transform_1(%arg0: i32) -> (i32, i32) {
    %c0_i32 = arith.constant 0 : i32
    %c0_i32_0 = arith.constant 0 : i32
    return %arg0, %c0_i32 : i32, i32
  }
  func.func @transform_2(%arg0: i32) -> (i32, i32) {
    %c0_i32 = arith.constant 0 : i32
    %c0_i32_0 = arith.constant 0 : i32
    return %arg0, %c0_i32 : i32, i32
  }
  func.func @transform_3(%arg0: i32) -> (i32, i32) {
    %c0_i32 = arith.constant 0 : i32
    %c0_i32_0 = arith.constant 0 : i32
    return %arg0, %c0_i32 : i32, i32
  }
  func.func @transform_4(%arg0: i32) -> (i32, i32) {
    %c0_i32 = arith.constant 0 : i32
    %c0_i32_0 = arith.constant 0 : i32
    %c0_i32_1 = arith.constant 0 : i32
    return %c0_i32, %c0_i32_0 : i32, i32
  }
  func.func @transform_5(%arg0: i32) -> (i32, i32) {
    %c0_i32 = arith.constant 0 : i32
    %c0_i32_0 = arith.constant 0 : i32
    %c0_i32_1 = arith.constant 0 : i32
    return %c0_i32, %c0_i32_0 : i32, i32
  }
  func.func @transform_6(%arg0: i32) -> (i32, i32) {
    %c0_i32 = arith.constant 0 : i32
    %c0_i32_0 = arith.constant 0 : i32
    return %arg0, %c0_i32 : i32, i32
  }
}

</mosaic_0001>

<bundles_post_ra>
// kernel: tpu_custom_call.1
= control target key start
LH: loop header
LB: loop body
LE: loop exit
PB: predicated region body
PF: predicated region fallthrough
CT: control target
= control target key end

     0   :  { %11 = vsyncpa [#allocation3], 0  ;;  %s588_s0 = inlined_call_operand.hbm [shape: f32[8,128], index: 0, kind: input, shape index: {}]   ;;  %s589_s1 = inlined_call_operand.hbm [shape: f32[8,128], index: 1, kind: input, shape index: {}]   ;;  %s590_s2 = inlined_call_operand.hbm [shape: f32[8,128], index: 2, kind: input, shape index: {}]   ;;  %s591_s3 = inlined_call_operand.hbm [shape: f32[8,128], index: 3, kind: input, shape index: {}]   ;;  %s592_s4 = inlined_call_operand.hbm [shape: f32[512,128], index: 4, kind: input, shape index: {}]   ;;  %s593_s5 = inlined_call_operand.vmem [shape: f32[1,128], index: 5, kind: input, shape index: {}]   ;;  %s594_s6 = inlined_call_operand.hbm [shape: f32[8,128], index: 6, kind: output, shape index: {}]  }
   0x1   :  { %12 = vsyncpa [#allocation6], 0 }
   0x2   :  { %13 = vsyncpa [#allocation9], 0 }
   0x3   :  { %14 = vsyncpa [#allocation4], 0  ;;  %s524_s21 = smov [#allocation5]   ;;  %s525_s23 = smov [#allocation8]  }
   0x4   :  { %s31_s22 = sshll.u32 %s524_s21, 4  ;;  %s51_s24 = sshll.u32 %s525_s23, 4  ;;  %s32_s22 = int_to_ptr.vmem [resolvable:$true] %s31_s22  ;;  %s52_s24 = int_to_ptr.vmem [resolvable:$true] %s51_s24 }
   0x5   :  { %s404_s25 = scalar_lea.vmem %s32_s22, 128  ;;  %p409_p1 = scmp.lt.s32.totalorder %s32_s22, %s32_s22 }
   0x6   :  { %p405_p0 = scmp.ne.s32.totalorder %s32_s22, %s404_s25  ;;  %p410_p2 = scmp.lt.s32.totalorder %s404_s25, %s404_s25 }
   0x8   :  { %p411_p3 = por %p410_p2, %p409_p1 }
   0xa   :  { %p412_p4 = pnand %p411_p3, %p405_p0 }
   0xc   :  { %415 = shalt.err (!%p412_p4)
}
   0xd   :  { %34 = dma.hbm_to_vmem [thread:$0]  %s589_s1, 128, %s32_s22, [#allocation6]  }
   0xe   :  { %s424_s28 = scalar_lea.vmem %s52_s24, 128  ;;  %p429_p6 = scmp.lt.s32.totalorder %s52_s24, %s52_s24 }
   0xf   :  { %p425_p5 = scmp.ne.s32.totalorder %s52_s24, %s424_s28  ;;  %p430_p7 = scmp.lt.s32.totalorder %s424_s28, %s424_s28 }
  0x11   :  { %p431_p8 = por %p430_p7, %p429_p6 }
  0x13   :  { %p432_p9 = pnand %p431_p8, %p425_p5 }
  0x15   :  { %435 = shalt.err (!%p432_p9)
}
  0x16   :  { %54 = dma.hbm_to_vmem [thread:$0]  %s591_s3, 128, %s52_s24, [#allocation9]  }
  0x17   :  { %s526_s7 = smov [#allocation2]   ;;  %s527_s9 = smov [#allocation7]  }
  0x18   :  { %s21_s8 = sshll.u32 %s526_s7, 4  ;;  %s41_s10 = sshll.u32 %s527_s9, 4  ;;  %s22_s8 = int_to_ptr.vmem [resolvable:$true] %s21_s8  ;;  %s42_s10 = int_to_ptr.vmem [resolvable:$true] %s41_s10 }
  0x19   :  { %s444_s11 = scalar_lea.vmem %s22_s8, 128  ;;  %p449_p11 = scmp.lt.s32.totalorder %s22_s8, %s22_s8 }
  0x1a   :  { %p445_p10 = scmp.ne.s32.totalorder %s22_s8, %s444_s11  ;;  %p450_p12 = scmp.lt.s32.totalorder %s444_s11, %s444_s11 }
  0x1c   :  { %p451_p13 = por %p450_p12, %p449_p11 }
  0x1e   :  { %p452_p0 = pnand %p451_p13, %p445_p10 }
  0x20   :  { %455 = shalt.err (!%p452_p0)
}
  0x21   :  { %24 = dma.hbm_to_vmem [thread:$0]  %s588_s0, 128, %s22_s8, [#allocation3]  }
  0x22   :  { %s464_s13 = scalar_lea.vmem %s42_s10, 128  ;;  %p469_p2 = scmp.lt.s32.totalorder %s42_s10, %s42_s10 }
  0x23   :  { %p465_p1 = scmp.ne.s32.totalorder %s42_s10, %s464_s13  ;;  %p470_p3 = scmp.lt.s32.totalorder %s464_s13, %s464_s13 }
  0x25   :  { %p471_p4 = por %p470_p3, %p469_p2 }
  0x27   :  { %p472_p5 = pnand %p471_p4, %p465_p1 }
  0x29   :  { %475 = shalt.err (!%p472_p5)
}
  0x2a   :  { %44 = dma.hbm_to_vmem [thread:$0]  %s590_s2, 128, %s42_s10, [#allocation6]  }
  0x2b   :  { %s528_s15 = smov [#allocation10]  }
  0x2c   :  { %s60_s16 = sshll.u32 %s528_s15, 4  ;;  %s61_s16 = int_to_ptr.vmem [resolvable:$true] %s60_s16 }
  0x2d   :  { %s484_s17 = scalar_lea.vmem %s61_s16, 8192  ;;  %p489_p7 = scmp.lt.s32.totalorder %s61_s16, %s61_s16 }
  0x2e   :  { %p485_p6 = scmp.ne.s32.totalorder %s61_s16, %s484_s17  ;;  %p490_p8 = scmp.lt.s32.totalorder %s484_s17, %s484_s17 }
  0x30   :  { %p491_p9 = por %p490_p8, %p489_p7 }
  0x32   :  { %p492_p10 = pnand %p491_p9, %p485_p6 }
  0x34   :  { %495 = shalt.err (!%p492_p10)
}
  0x35   :  { %s529_s0 = smov 128   ;;  %s530_s18 = smov 8  }
  0x36   :  { %66 = dma.hbm_to_vmem [thread:$0]  %s592_s4, 8192, %s61_s16, [#allocation9], %s529_s0, %s529_s0, %s530_s18  }
  0x37   :  { %516 = dma.done.wait [#allocation3], 128  }
  0x38   :  { %517 = vsyncadd [#allocation3], 4294967168 }
  0x39   :  { %518 = dma.done.wait [#allocation6], 256  }
  0x3a   :  { %519 = vsyncadd [#allocation6], 4294967040 }
  0x3b   :  { %520 = dma.done.wait [#allocation9], 8320  }
  0x3c   :  { %521 = vsyncadd [#allocation9], 4294958976  ;;  %v119_v0 = vld [vmem:[#allocation10 + $0xf8] sm:$0xff]  ;;  %v118_v4 = vld [vmem:[#allocation10 + $0xf0] sm:$0xff]  ;;  %s531_s21 = smov [#allocation11]  }
  0x3d   :  { %v151_v1 = vld [vmem:[#allocation10 + $0x1f8] sm:$0xff]  ;;  %318 = vmatprep.subr.mxu0 %v119_v0  ;;  %v150_v5 = vld [vmem:[#allocation10 + $0x1f0] sm:$0xff]  ;;  %v117_v8 = vld [vmem:[#allocation10 + $0xe8] sm:$0xff]  ;;  %s306_s22 = sshll.u32 %s531_s21, 4  ;;  %s307_s22 = int_to_ptr.vmem [resolvable:$true] %s306_s22 }
  0x3e   :  { %v103_v2 = vld [vmem:[#allocation10 + $0x78] sm:$0xff]  ;;  %353 = vmatprep.subr.mxu1 %v151_v1  ;;  %v102_v6 = vld [vmem:[#allocation10 + $0x70] sm:$0xff]  ;;  %v149_v9 = vld [vmem:[#allocation10 + $0x1e8] sm:$0xff]  ;;  %s496_s23 = scalar_lea.vmem %s307_s22, 128  ;;  %p501_p12 = scmp.lt.s32.totalorder %s307_s22, %s307_s22 }
  0x3f   :  { %v135_v3 = vld [vmem:[#allocation10 + $0x178] sm:$0xff]  ;;  %319 = vmatpush3.msra.mxu0 %v103_v2  ;;  %v134_v7 = vld [vmem:[#allocation10 + $0x170] sm:$0xff]  ;;  %v101_v10 = vld [vmem:[#allocation10 + $0x68] sm:$0xff]  ;;  %p497_p11 = scmp.ne.s32.totalorder %s307_s22, %s496_s23  ;;  %p502_p13 = scmp.lt.s32.totalorder %s496_s23, %s496_s23 }
  0x40   :  { %354 = vmatpush3.msra.mxu1 %v135_v3  ;;  %320 = vmatprep.subr.mxu0 %v118_v4  ;;  %v133_v11 = vld [vmem:[#allocation10 + $0x168] sm:$0xff]  ;;  %v116_v12 = vld [vmem:[#allocation10 + $0xe0] sm:$0xff]  ;;  %v115_v16 = vld [vmem:[#allocation10 + $0xd8] sm:$0xff] }
  0x41   :  { %355 = vmatprep.subr.mxu1 %v150_v5  ;;  %321 = vmatpush3.msra.mxu0 %v102_v6  ;;  %v148_v13 = vld [vmem:[#allocation10 + $0x1e0] sm:$0xff]  ;;  %v147_v17 = vld [vmem:[#allocation10 + $0x1d8] sm:$0xff]  ;;  %v114_v20 = vld [vmem:[#allocation10 + $0xd0] sm:$0xff]  ;;  %p503_p0 = por %p502_p13, %p501_p12 }
  0x42   :  { %356 = vmatpush3.msra.mxu1 %v134_v7  ;;  %322 = vmatprep.subr.mxu0 %v117_v8  ;;  %v100_v14 = vld [vmem:[#allocation10 + $0x60] sm:$0xff]  ;;  %v99_v18 = vld [vmem:[#allocation10 + $0x58] sm:$0xff]  ;;  %v146_v21 = vld [vmem:[#allocation10 + $0x1d0] sm:$0xff] }
  0x43   :  { %357 = vmatprep.subr.mxu1 %v149_v9  ;;  %v132_v15 = vld [vmem:[#allocation10 + $0x160] sm:$0xff]  ;;  %323 = vmatpush3.msra.mxu0 %v101_v10  ;;  %v131_v19 = vld [vmem:[#allocation10 + $0x158] sm:$0xff]  ;;  %v98_v22 = vld [vmem:[#allocation10 + $0x50] sm:$0xff]  ;;  %p504_p1 = pnand %p503_p0, %p497_p11 }
  0x44   :  { %358 = vmatpush3.msra.mxu1 %v133_v11  ;;  %324 = vmatprep.subr.mxu0 %v116_v12  ;;  %v130_v23 = vld [vmem:[#allocation10 + $0x150] sm:$0xff]  ;;  %v113_v24 = vld [vmem:[#allocation10 + $0xc8] sm:$0xff]  ;;  %v112_v28 = vld [vmem:[#allocation10 + $0xc0] sm:$0xff] }
  0x45   :  { %359 = vmatprep.subr.mxu1 %v148_v13  ;;  %325 = vmatpush3.msra.mxu0 %v100_v14  ;;  %v145_v25 = vld [vmem:[#allocation10 + $0x1c8] sm:$0xff]  ;;  %v144_v29 = vld [vmem:[#allocation10 + $0x1c0] sm:$0xff]  ;;  %v111_v32 = vld [vmem:[#allocation10 + $0xb8] sm:$0xff] }
  0x46   :  { %360 = vmatpush3.msra.mxu1 %v132_v15  ;;  %326 = vmatprep.subr.mxu0 %v115_v16  ;;  %v97_v26 = vld [vmem:[#allocation10 + $0x48] sm:$0xff]  ;;  %v96_v30 = vld [vmem:[#allocation10 + $0x40] sm:$0xff]  ;;  %v143_v33 = vld [vmem:[#allocation10 + $0x1b8] sm:$0xff] }
  0x47   :  { %361 = vmatprep.subr.mxu1 %v147_v17  ;;  %327 = vmatpush3.msra.mxu0 %v99_v18  ;;  %v129_v27 = vld [vmem:[#allocation10 + $0x148] sm:$0xff]  ;;  %v128_v31 = vld [vmem:[#allocation10 + $0x140] sm:$0xff]  ;;  %v95_v34 = vld [vmem:[#allocation10 + $0x38] sm:$0xff] }
  0x48   :  { %362 = vmatpush3.msra.mxu1 %v131_v19  ;;  %328 = vmatprep.subr.mxu0 %v114_v20  ;;  %v127_v35 = vld [vmem:[#allocation10 + $0x138] sm:$0xff]  ;;  %v110_v36 = vld [vmem:[#allocation10 + $0xb0] sm:$0xff]  ;;  %v109_v40 = vld [vmem:[#allocation10 + $0xa8] sm:$0xff] }
  0x49   :  { %363 = vmatprep.subr.mxu1 %v146_v21  ;;  %329 = vmatpush3.msra.mxu0 %v98_v22  ;;  %v142_v37 = vld [vmem:[#allocation10 + $0x1b0] sm:$0xff]  ;;  %v141_v41 = vld [vmem:[#allocation10 + $0x1a8] sm:$0xff]  ;;  %v108_v44 = vld [vmem:[#allocation10 + $0xa0] sm:$0xff] }
  0x4a   :  { %364 = vmatpush3.msra.mxu1 %v130_v23  ;;  %330 = vmatprep.subr.mxu0 %v113_v24  ;;  %v94_v38 = vld [vmem:[#allocation10 + $0x30] sm:$0xff]  ;;  %v93_v42 = vld [vmem:[#allocation10 + $0x28] sm:$0xff]  ;;  %v140_v45 = vld [vmem:[#allocation10 + $0x1a0] sm:$0xff] }
  0x4b   :  { %365 = vmatprep.subr.mxu1 %v145_v25  ;;  %331 = vmatpush3.msra.mxu0 %v97_v26  ;;  %v126_v39 = vld [vmem:[#allocation10 + $0x130] sm:$0xff]  ;;  %v125_v43 = vld [vmem:[#allocation10 + $0x128] sm:$0xff]  ;;  %v92_v46 = vld [vmem:[#allocation10 + $0x20] sm:$0xff] }
  0x4c   :  { %366 = vmatpush3.msra.mxu1 %v129_v27  ;;  %332 = vmatprep.subr.mxu0 %v112_v28  ;;  %v124_v47 = vld [vmem:[#allocation10 + $0x120] sm:$0xff]  ;;  %v107_v48 = vld [vmem:[#allocation10 + $0x98] sm:$0xff]  ;;  %v106_v52 = vld [vmem:[#allocation10 + $0x90] sm:$0xff] }
  0x4d   :  { %367 = vmatprep.subr.mxu1 %v144_v29  ;;  %333 = vmatpush3.msra.mxu0 %v96_v30  ;;  %v139_v49 = vld [vmem:[#allocation10 + $0x198] sm:$0xff]  ;;  %v138_v53 = vld [vmem:[#allocation10 + $0x190] sm:$0xff]  ;;  %v105_v56 = vld [vmem:[#allocation10 + $0x88] sm:$0xff] }
  0x4e   :  { %368 = vmatpush3.msra.mxu1 %v128_v31  ;;  %334 = vmatprep.subr.mxu0 %v111_v32  ;;  %v91_v50 = vld [vmem:[#allocation10 + $0x18] sm:$0xff]  ;;  %v90_v54 = vld [vmem:[#allocation10 + $0x10] sm:$0xff]  ;;  %v137_v57 = vld [vmem:[#allocation10 + $0x188] sm:$0xff] }
  0x4f   :  { %369 = vmatprep.subr.mxu1 %v143_v33  ;;  %335 = vmatpush3.msra.mxu0 %v95_v34  ;;  %v123_v51 = vld [vmem:[#allocation10 + $0x118] sm:$0xff]  ;;  %v122_v55 = vld [vmem:[#allocation10 + $0x110] sm:$0xff]  ;;  %v89_v58 = vld [vmem:[#allocation10 + $0x8] sm:$0xff] }
  0x50   :  { %370 = vmatpush3.msra.mxu1 %v127_v35  ;;  %336 = vmatprep.subr.mxu0 %v110_v36  ;;  %v121_v59 = vld [vmem:[#allocation10 + $0x108] sm:$0xff]  ;;  %v104_v60 = vld [vmem:[#allocation10 + $0x80] sm:$0xff]  ;;  %v87_v1 = vld [vmem:[#allocation8] sm:$0xff] }
  0x51   :  { %371 = vmatprep.subr.mxu1 %v142_v37  ;;  %337 = vmatpush3.msra.mxu0 %v94_v38  ;;  %v136_v61 = vld [vmem:[#allocation10 + $0x180] sm:$0xff]  ;;  %v85_v63 = vld [vmem:[#allocation5] sm:$0xff]  ;;  %v86_v3 = vld [vmem:[#allocation7] sm:$0xff] }
  0x52   :  { %372 = vmatpush3.msra.mxu1 %v126_v39  ;;  %338 = vmatprep.subr.mxu0 %v109_v40  ;;  %v88_v62 = vld [vmem:[#allocation10] sm:$0xff] }
  0x53   :  { %373 = vmatprep.subr.mxu1 %v141_v41  ;;  %339 = vmatpush3.msra.mxu0 %v93_v42  ;;  %v120_v0 = vld [vmem:[#allocation10 + $0x100] sm:$0xff] }
  0x54   :  { %374 = vmatpush3.msra.mxu1 %v125_v43  ;;  %340 = vmatprep.subr.mxu0 %v108_v44  ;;  %v84_v2 = vld [vmem:[#allocation2] sm:$0xff] }
  0x55   :  { %375 = vmatprep.subr.mxu1 %v140_v45  ;;  %341 = vmatpush3.msra.mxu0 %v92_v46  ;;  %v317_v6 = vld [vmem:[%s593_s5] ss:$0 sm:$0xff] }
  0x56   :  { %376 = vmatpush3.msra.mxu1 %v124_v47  ;;  %342 = vmatprep.subr.mxu0 %v107_v48 }
  0x57   :  { %377 = vmatprep.subr.mxu1 %v139_v49  ;;  %343 = vmatpush3.msra.mxu0 %v91_v50 }
  0x58   :  { %378 = vmatpush3.msra.mxu1 %v123_v51  ;;  %344 = vmatprep.subr.mxu0 %v106_v52 }
  0x59   :  { %379 = vmatprep.subr.mxu1 %v138_v53  ;;  %345 = vmatpush3.msra.mxu0 %v90_v54 }
  0x5a   :  { %380 = vmatpush3.msra.mxu1 %v122_v55  ;;  %346 = vmatprep.subr.mxu0 %v105_v56 }
  0x5b   :  { %381 = vmatprep.subr.mxu1 %v137_v57  ;;  %347 = vmatpush3.msra.mxu0 %v89_v58 }
  0x5c   :  { %382 = vmatpush3.msra.mxu1 %v121_v59  ;;  %348 = vmatprep.subr.mxu0 %v104_v60 }
  0x5d   :  { %383 = vmatprep.subr.mxu1 %v136_v61  ;;  %349 = vmatpush3.msra.mxu0 %v88_v62 }
  0x5e   :  { %223 = vmatprep.mubr.f32.mxu0 %v85_v63  ;;  %384 = vmatpush3.msra.mxu1 %v120_v0 }
  0x5f   :  { %293 = vmatprep.mubr.f32.mxu1 %v87_v1  ;;  %224 = vmatmul.mubr.f32.vlgmr.msra.gmra.mxu0 %v84_v2 }
  0x60   :  { %294 = vmatmul.mubr.f32.vlgmr.msra.gmra.mxu1 %v86_v3 }
 0x11f   :  { %v350_v4 = vpop.f32.mrf.mxu0 }
 0x120   :  { %v385_v5 = vpop.f32.mrf.mxu1 }
 0x121   :  { %v351_v7 = vpop.f32.mrf.mxu0 }
 0x122   :  { %v386_v8 = vpop.f32.mrf.mxu1  ;;  %v352_v9 = vadd.f32 %v351_v7, %v350_v4 }
 0x123   :  { %v387_v11 = vadd.f32 %v386_v8, %v385_v5 }
 0x124   :  { %v226_v10 = vadd.f32 %v352_v9, %v317_v6 }
 0x126   :  { %v296_v12 = vadd.f32 %v387_v11, %v226_v10 }
 0x128   :  { %299 = vst [vmem:[#allocation11] sm:$0xff] %v296_v12 }
 0x129   :  { %507 = shalt.err (!%p504_p1)
}
 0x12a   :  { %309 = dma.vmem_to_hbm [thread:$0]  %s307_s22, 128, %s594_s6, [#allocation4]  }
 0x12b   :  { %522 = dma.done.wait [#allocation4], 128  }
 0x12c   :  { %523 = vsyncadd [#allocation4], 4294967168 }
 0x12d   :  { %313 = vsyncpa [#allocation3], 1 }
 0x12e   :  { %314 = vsyncpa [#allocation6], 1 }
 0x12f   :  { %315 = vsyncpa [#allocation9], 1 }
 0x130   :  { %316 = vsyncpa [#allocation4], 1 }

</bundles_post_ra>
